<compile_context>
chip_gen: v7x
topology: tpu7x:2x2x1
jax: 0.10.0
libtpu: 0.0.40
codegen_flags: <defaults>
</compile_context>

<pallas_src>
import numpy as np
import jax
import jax.numpy as jnp
from jax.experimental import pallas as pl
from jax.experimental.pallas import tpu as pltpu

EPS = 1e-5
LANE = 128
SUB = 16  # batch rows rounded to 16 so bf16 tiles are sublane-pack aligned


def _round_up(x, m):
    return ((x + m - 1) // m) * m


def dqn_forward(x, params, *, mxu_dtype=jnp.bfloat16, batch_tile=None):
    """DQN forward.  x: (B, input_size).  params: w1..w4 as (in, out), b1..b4 as
    (1, out), g1..g3 / be1..be3 as (1, hidden).  mxu_dtype feeds the MXU matmuls
    (bf16 on v6e/v7x, f32 for exactness); BN math is always f32."""
    B, IN = x.shape
    H = params["w1"].shape[1]
    O = params["w4"].shape[1]

    # Lane-pad feature dims; sublane-pad / tile the batch.
    IN_P = _round_up(IN, LANE)
    H_P = _round_up(H, LANE)
    O_P = _round_up(O, LANE)
    C = max(H_P, O_P)

    TB = _round_up(B if batch_tile is None else batch_tile, SUB)
    TB = min(TB, 512)
    B_P = _round_up(B, TB)
    n_tiles = B_P // TB

    mxu_dtype = np.dtype(mxu_dtype)
    mxu_nbytes = mxu_dtype.itemsize

    # ---- pack parameters (one resident weight slab + one f32 vector slab) -------
    w_rows = IN_P + 3 * H_P
    w_slab = jnp.zeros((w_rows, C), mxu_dtype)

    def _put_w(slab, r0, w):
        return slab.at[r0:r0 + w.shape[0], :w.shape[1]].set(w.astype(mxu_dtype))

    w_slab = _put_w(w_slab, 0, params["w1"])
    w_slab = _put_w(w_slab, IN_P, params["w2"])
    w_slab = _put_w(w_slab, IN_P + H_P, params["w3"])
    w_slab = _put_w(w_slab, IN_P + 2 * H_P, params["w4"])

    # Rows: [g1, be1, g2, be2, g3, be3, b4, <pad>]  (fc1..fc3 biases unused: they
    # cancel exactly against the BN batch-mean subtraction).
    vec_slab = jnp.zeros((8, C), jnp.float32)
    for r, name in enumerate(("g1", "be1", "g2", "be2", "g3", "be3", "b4")):
        v = jnp.reshape(params[name], (-1,)).astype(jnp.float32)
        vec_slab = vec_slab.at[r, : v.shape[0]].set(v)

    # Zero-padded x: pad rows/cols contribute exactly zero to the matmuls and are
    # kept out of the BN statistics inside the kernel.
    x_p = jnp.zeros((B_P, IN_P), mxu_dtype)
    x_p = x_p.at[:B, :IN].set(x.astype(jnp.float32).astype(mxu_dtype))

    inv_b = 1.0 / float(B)          # true batch size (compile-time constant)
    need_row_mask = B_P > B

    def kernel(x_ref, w_ref, vec_ref, out_ref, h1_ref):
        i = pl.program_id(0)

        # ---- streamed phase: fc1 for this batch tile into resident scratch -----
        w1 = w_ref[0:IN_P, 0:H_P]
        row0 = pl.multiple_of(i * TB, TB)
        h1_ref[pl.ds(row0, TB), :] = jnp.dot(
            x_ref[...], w1, preferred_element_type=jnp.float32)

        # ---- final phase: full-batch BN + fc2..fc4 once all tiles have landed --
        @pl.when(i == pl.num_programs(0) - 1)
        def _():
            g1, be1 = vec_ref[0:1, :H_P], vec_ref[1:2, :H_P]
            g2, be2 = vec_ref[2:3, :H_P], vec_ref[3:4, :H_P]
            g3, be3 = vec_ref[4:5, :H_P], vec_ref[5:6, :H_P]
            b4 = vec_ref[6:7, :O_P]

            w2 = w_ref[IN_P:IN_P + H_P, 0:H_P]
            w3 = w_ref[IN_P + H_P:IN_P + 2 * H_P, 0:H_P]
            w4 = w_ref[IN_P + 2 * H_P:IN_P + 3 * H_P, 0:O_P]

            if need_row_mask:
                row_ids = jax.lax.broadcasted_iota(jnp.int32, (B_P, 1), 0)
                row_mask = row_ids < B
            else:
                row_mask = None

            def bn_relu(h, g, be):
                # Padded batch rows of h are exactly zero, so plain sums are
                # full-batch sums; divide by the TRUE batch size.  BN affine is
                # folded into one FMA per element (scale/shift are (1, H_P)).
                mean = jnp.sum(h, axis=0, keepdims=True) * inv_b
                meansq = jnp.sum(h * h, axis=0, keepdims=True) * inv_b
                var = jnp.maximum(meansq - mean * mean, 0.0)   # clamp roundoff
                scale = g * jax.lax.rsqrt(var + EPS)           # EUP slot
                shift = be - mean * scale
                y = jnp.maximum(h * scale + shift, 0.0)
                if row_mask is not None:
                    # Keep padded rows exactly zero so they stay out of the next
                    # layer's batch statistics.
                    y = jnp.where(row_mask, y, 0.0)
                return y

            h = bn_relu(h1_ref[...], g1, be1)
            h = bn_relu(jnp.dot(h.astype(mxu_dtype), w2,
                                preferred_element_type=jnp.float32), g2, be2)
            h = bn_relu(jnp.dot(h.astype(mxu_dtype), w3,
                                preferred_element_type=jnp.float32), g3, be3)
            # h3.view(h3.size(0), -1) is a no-op for 2-D activations.
            out_ref[...] = jnp.dot(h.astype(mxu_dtype), w4,
                                   preferred_element_type=jnp.float32) + b4

    # Explicit VMEM budget with headroom: double-buffered x tiles, resident weight
    # and vector slabs, resident output, h1 scratch, f32 elementwise temporaries.
    vmem_bytes = (2 * TB * IN_P * mxu_nbytes
                  + w_rows * C * mxu_nbytes
                  + 8 * C * 4
                  + B_P * O_P * 4
                  + B_P * H_P * 4
                  + 6 * B_P * H_P * 4)
    vmem_limit = int(min(max(2 * vmem_bytes, 4 << 20), 32 << 20))

    flops = 2 * B_P * (IN_P * H_P + 2 * H_P * H_P + H_P * O_P) + 12 * B_P * H_P
    bytes_accessed = (B_P * IN_P * mxu_nbytes + w_rows * C * mxu_nbytes
                      + 8 * C * 4 + B_P * O_P * 4)

    # TODO(synk): for batches too large for VMEM, stage h1 to HBM and split each BN
    # into a two-pass (stats-accumulate / apply) grid; on v7x the two TensorCores
    # would reduce partial sums via VMEM_SHARED/CMEM + core_barrier before applying.
    out_p = pl.pallas_call(
        kernel,
        out_shape=jax.ShapeDtypeStruct((B_P, O_P), jnp.float32),
        grid_spec=pltpu.PrefetchScalarGridSpec(
            num_scalar_prefetch=0,
            grid=(n_tiles,),
            in_specs=[
                pl.BlockSpec((TB, IN_P), lambda i: (i, 0)),     # x: streamed tiles
                pl.BlockSpec((w_rows, C), lambda i: (0, 0)),    # weights: resident
                pl.BlockSpec((8, C), lambda i: (0, 0)),         # vectors: resident
            ],
            out_specs=pl.BlockSpec((B_P, O_P), lambda i: (0, 0)),  # resident output
            scratch_shapes=[pltpu.VMEM((B_P, H_P), jnp.float32)],  # fc1 activations
        ),
        compiler_params=pltpu.CompilerParams(
            # BN couples the whole batch -> the batch-tile axis carries state.
            dimension_semantics=("arbitrary",),
            vmem_limit_bytes=vmem_limit,
        ),
        cost_estimate=pl.CostEstimate(
            flops=int(flops),
            transcendentals=int(3 * H_P),
            bytes_accessed=int(bytes_accessed),
        ),
    )(x_p, w_slab, vec_slab)

    return out_p[:B, :O]


def make_params(key, input_size, size_hidden, output_size):
    """Deterministic synthetic parameters matching the PyTorch module's shapes."""
    keys = jax.random.split(key, 14)
    dims = [(input_size, size_hidden),
            (size_hidden, size_hidden),
            (size_hidden, size_hidden),
            (size_hidden, output_size)]
    p = {}
    ki = 0
    for li, (din, dout) in enumerate(dims, start=1):
        # nn.Linear stores (out, in); we store transposed (in, out).
        p[f"w{li}"] = (jax.random.normal(keys[ki], (din, dout), jnp.float32)
                       * (1.0 / np.sqrt(din))); ki += 1
        p[f"b{li}"] = 0.1 * jax.random.normal(keys[ki], (1, dout), jnp.float32); ki += 1
    for li in (1, 2, 3):
        p[f"g{li}"] = 1.0 + 0.1 * jax.random.normal(
            keys[ki], (1, size_hidden), jnp.float32); ki += 1
        p[f"be{li}"] = 0.1 * jax.random.normal(
            keys[ki], (1, size_hidden), jnp.float32); ki += 1
    return p


def dqn_reference(x, params, mxu_dtype=jnp.float32):
    """Pure-JAX reference mirroring the PyTorch forward (training-mode BN),
    INCLUDING the fc1..fc3 biases, to validate the in-kernel exact cancellation.
    mxu_dtype mirrors the kernel's matmul-input cast (numerics-matched check)."""
    mxu_dtype = np.dtype(mxu_dtype)

    def mm(a, w):
        return jnp.dot(a.astype(mxu_dtype), w.astype(mxu_dtype),
                       preferred_element_type=jnp.float32)

    def bn_relu(h, g, be):
        mean = jnp.mean(h, axis=0, keepdims=True)
        var = jnp.mean((h - mean) ** 2, axis=0, keepdims=True)
        return jnp.maximum((h - mean) / jnp.sqrt(var + EPS) * g + be, 0.0)

    h = x.astype(jnp.float32)
    h = bn_relu(mm(h, params["w1"]) + params["b1"], params["g1"], params["be1"])
    h = bn_relu(mm(h, params["w2"]) + params["b2"], params["g2"], params["be2"])
    h = bn_relu(mm(h, params["w3"]) + params["b3"], params["g3"], params["be3"])
    return mm(h, params["w4"]) + params["b4"]


if __name__ == "__main__":
    key = jax.random.PRNGKey(0)
    configs = [
        # small canonical config, single grid step, no batch padding
        dict(batch=16, input_size=16, size_hidden=32, output_size=4, batch_tile=None),
        # exercises a >1 batch grid, batch padding + row masking
        dict(batch=20, input_size=12, size_hidden=48, output_size=6, batch_tile=16),
    ]
    for cfg in configs:
        key, kx, kp = jax.random.split(key, 3)
        x = jax.random.normal(kx, (cfg["batch"], cfg["input_size"]), jnp.float32)
        params = make_params(kp, cfg["input_size"], cfg["size_hidden"],
                             cfg["output_size"])

        # Exact path (f32 MXU inputs) vs f32 reference.
        out32 = jax.block_until_ready(
            dqn_forward(x, params, mxu_dtype=jnp.float32,
                        batch_tile=cfg["batch_tile"]))
        ref32 = dqn_reference(x, params, mxu_dtype=jnp.float32)
        assert out32.shape == (cfg["batch"], cfg["output_size"])
        assert jnp.allclose(out32, ref32, atol=1e-4, rtol=1e-4), "f32 mismatch"

        # Production path (bf16 MXU inputs, f32 accumulation + f32 BN math) vs a
        # numerics-matched bf16 reference.
        out16 = jax.block_until_ready(
            dqn_forward(x, params, mxu_dtype=jnp.bfloat16,
                        batch_tile=cfg["batch_tile"]))
        ref16 = dqn_reference(x, params, mxu_dtype=jnp.bfloat16)
        assert out16.shape == (cfg["batch"], cfg["output_size"])
        assert jnp.allclose(out16, ref16, atol=1e-2, rtol=1e-2), "bf16 mismatch"

    print("KERNEL_OK")
</pallas_src>

<mosaic_0001>
module attributes {stable_mosaic.version = 11 : i64} {
  func.func @kernel(%arg0: i32, %arg1: memref<16x128xf32, #tpu.memory_space<vmem>>, %arg2: memref<512x128xf32, #tpu.memory_space<vmem>>, %arg3: memref<8x128xf32, #tpu.memory_space<vmem>>, %arg4: memref<16x128xf32, #tpu.memory_space<vmem>>, %arg5: memref<16x128xf32, #tpu.memory_space<vmem>>) attributes {dimension_semantics = [#tpu.dimension_semantics<arbitrary>], iteration_bounds = array<i64: 1>, scalar_prefetch = 0 : i64, scratch_operands = 1 : i64, tpu.core_type = #tpu.core_type<tc>, window_params = [{transform_indices = @transform_0, window_bounds = array<i64: 16, 128>}, {pipeline_mode = #tpu.pipeline_mode<synchronous>, transform_indices = @transform_1, window_bounds = array<i64: 512, 128>}, {pipeline_mode = #tpu.pipeline_mode<synchronous>, transform_indices = @transform_2, window_bounds = array<i64: 8, 128>}, {pipeline_mode = #tpu.pipeline_mode<synchronous>, transform_indices = @transform_3, window_bounds = array<i64: 16, 128>}]} {
    %c0 = arith.constant 0 : index
    %c0_0 = arith.constant 0 : index
    %0 = vector.load %arg2[%c0, %c0_0] : memref<512x128xf32, #tpu.memory_space<vmem>>, vector<128x128xf32>
    %c16_i32 = arith.constant 16 : i32
    %1 = arith.muli %arg0, %c16_i32 : i32
    %2 = tpu.assume_multiple %1, 16 : i32
    %c0_1 = arith.constant 0 : index
    %c0_2 = arith.constant 0 : index
    %3 = vector.load %arg1[%c0_1, %c0_2] : memref<16x128xf32, #tpu.memory_space<vmem>>, vector<16x128xf32>
    %cst = arith.constant dense<0.000000e+00> : vector<16x128xf32>
    %4 = tpu.matmul %3, %0, %cst {dimension_numbers = #tpu.dot_dimension_numbers<[1], [0], [0], [1], [0, 0, 1, 1], [], []>} : vector<16x128xf32>, vector<128x128xf32>, vector<16x128xf32> -> vector<16x128xf32>
    %5 = arith.index_cast %2 : i32 to index
    %c0_3 = arith.constant 0 : index
    %6 = vector.load %arg5[%5, %c0_3] : memref<16x128xf32, #tpu.memory_space<vmem>>, vector<16x128xf32>
    tpu.vector_store %arg5[%5, %c0_3], %4 {strides = array<i32>} : memref<16x128xf32, #tpu.memory_space<vmem>>, vector<16x128xf32>,
    %c0_i32 = arith.constant 0 : i32
    %7 = arith.cmpi eq, %arg0, %c0_i32 : i32
    %8 = arith.extui %7 : i1 to i32
    %c0_i32_4 = arith.constant 0 : i32
    %9 = arith.cmpi ne, %8, %c0_i32_4 : i32
    scf.if %9 {
      %c0_5 = arith.constant 0 : index
      %c0_6 = arith.constant 0 : index
      %10 = vector.load %arg3[%c0_5, %c0_6] : memref<8x128xf32, #tpu.memory_space<vmem>>, vector<1x128xf32>
      %c1 = arith.constant 1 : index
      %c0_7 = arith.constant 0 : index
      %11 = vector.load %arg3[%c1, %c0_7] : memref<8x128xf32, #tpu.memory_space<vmem>>, vector<1x128xf32>
      %c2 = arith.constant 2 : index
      %c0_8 = arith.constant 0 : index
      %12 = vector.load %arg3[%c2, %c0_8] : memref<8x128xf32, #tpu.memory_space<vmem>>, vector<1x128xf32>
      %c3 = arith.constant 3 : index
      %c0_9 = arith.constant 0 : index
      %13 = vector.load %arg3[%c3, %c0_9] : memref<8x128xf32, #tpu.memory_space<vmem>>, vector<1x128xf32>
      %c4 = arith.constant 4 : index
      %c0_10 = arith.constant 0 : index
      %14 = vector.load %arg3[%c4, %c0_10] : memref<8x128xf32, #tpu.memory_space<vmem>>, vector<1x128xf32>
      %c5 = arith.constant 5 : index
      %c0_11 = arith.constant 0 : index
      %15 = vector.load %arg3[%c5, %c0_11] : memref<8x128xf32, #tpu.memory_space<vmem>>, vector<1x128xf32>
      %c6 = arith.constant 6 : index
      %c0_12 = arith.constant 0 : index
      %16 = vector.load %arg3[%c6, %c0_12] : memref<8x128xf32, #tpu.memory_space<vmem>>, vector<1x128xf32>
      %c128 = arith.constant 128 : index
      %c0_13 = arith.constant 0 : index
      %17 = vector.load %arg2[%c128, %c0_13] : memref<512x128xf32, #tpu.memory_space<vmem>>, vector<128x128xf32>
      %c256 = arith.constant 256 : index
      %c0_14 = arith.constant 0 : index
      %18 = vector.load %arg2[%c256, %c0_14] : memref<512x128xf32, #tpu.memory_space<vmem>>, vector<128x128xf32>
      %c384 = arith.constant 384 : index
      %c0_15 = arith.constant 0 : index
      %19 = vector.load %arg2[%c384, %c0_15] : memref<512x128xf32, #tpu.memory_space<vmem>>, vector<128x128xf32>
      %c0_16 = arith.constant 0 : index
      %c0_17 = arith.constant 0 : index
      %20 = vector.load %arg5[%c0_16, %c0_17] : memref<16x128xf32, #tpu.memory_space<vmem>>, vector<16x128xf32>
      %cst_18 = arith.constant dense<0.000000e+00> : vector<128xf32>
      %21 = vector.multi_reduction <add>, %20, %cst_18 [0] : vector<16x128xf32> to vector<128xf32>
      %22 = vector.shape_cast %21 : vector<128xf32> to vector<1x128xf32>
      %cst_19 = arith.constant 6.250000e-02 : f32
      %23 = vector.broadcast %cst_19 : f32 to vector<1x128xf32>
      %24 = arith.mulf %22, %23 : vector<1x128xf32>
      %25 = arith.mulf %20, %20 : vector<16x128xf32>
      %cst_20 = arith.constant dense<0.000000e+00> : vector<128xf32>
      %26 = vector.multi_reduction <add>, %25, %cst_20 [0] : vector<16x128xf32> to vector<128xf32>
      %27 = vector.shape_cast %26 : vector<128xf32> to vector<1x128xf32>
      %cst_21 = arith.constant 6.250000e-02 : f32
      %28 = vector.broadcast %cst_21 : f32 to vector<1x128xf32>
      %29 = arith.mulf %27, %28 : vector<1x128xf32>
      %30 = arith.mulf %24, %24 : vector<1x128xf32>
      %31 = arith.subf %29, %30 : vector<1x128xf32>
      %cst_22 = arith.constant 0.000000e+00 : f32
      %32 = vector.broadcast %cst_22 : f32 to vector<1x128xf32>
      %33 = arith.maximumf %31, %32 : vector<1x128xf32>
      %cst_23 = arith.constant 9.99999974E-6 : f32
      %34 = vector.broadcast %cst_23 : f32 to vector<1x128xf32>
      %35 = arith.addf %33, %34 : vector<1x128xf32>
      %36 = math.rsqrt %35 : vector<1x128xf32>
      %37 = arith.mulf %10, %36 : vector<1x128xf32>
      %38 = arith.mulf %24, %37 : vector<1x128xf32>
      %39 = arith.subf %11, %38 : vector<1x128xf32>
      %40 = vector.broadcast %37 : vector<1x128xf32> to vector<16x128xf32>
      %41 = arith.mulf %20, %40 : vector<16x128xf32>
      %42 = vector.broadcast %39 : vector<1x128xf32> to vector<16x128xf32>
      %43 = arith.addf %41, %42 : vector<16x128xf32>
      %cst_24 = arith.constant 0.000000e+00 : f32
      %44 = vector.broadcast %cst_24 : f32 to vector<16x128xf32>
      %45 = arith.maximumf %43, %44 : vector<16x128xf32>
      %cst_25 = arith.constant dense<0.000000e+00> : vector<16x128xf32>
      %46 = tpu.matmul %45, %17, %cst_25 {dimension_numbers = #tpu.dot_dimension_numbers<[1], [0], [0], [1], [0, 0, 1, 1], [], []>} : vector<16x128xf32>, vector<128x128xf32>, vector<16x128xf32> -> vector<16x128xf32>
      %cst_26 = arith.constant dense<0.000000e+00> : vector<128xf32>
      %47 = vector.multi_reduction <add>, %46, %cst_26 [0] : vector<16x128xf32> to vector<128xf32>
      %48 = vector.shape_cast %47 : vector<128xf32> to vector<1x128xf32>
      %cst_27 = arith.constant 6.250000e-02 : f32
      %49 = vector.broadcast %cst_27 : f32 to vector<1x128xf32>
      %50 = arith.mulf %48, %49 : vector<1x128xf32>
      %51 = arith.mulf %46, %46 : vector<16x128xf32>
      %cst_28 = arith.constant dense<0.000000e+00> : vector<128xf32>
      %52 = vector.multi_reduction <add>, %51, %cst_28 [0] : vector<16x128xf32> to vector<128xf32>
      %53 = vector.shape_cast %52 : vector<128xf32> to vector<1x128xf32>
      %cst_29 = arith.constant 6.250000e-02 : f32
      %54 = vector.broadcast %cst_29 : f32 to vector<1x128xf32>
      %55 = arith.mulf %53, %54 : vector<1x128xf32>
      %56 = arith.mulf %50, %50 : vector<1x128xf32>
      %57 = arith.subf %55, %56 : vector<1x128xf32>
      %cst_30 = arith.constant 0.000000e+00 : f32
      %58 = vector.broadcast %cst_30 : f32 to vector<1x128xf32>
      %59 = arith.maximumf %57, %58 : vector<1x128xf32>
      %cst_31 = arith.constant 9.99999974E-6 : f32
      %60 = vector.broadcast %cst_31 : f32 to vector<1x128xf32>
      %61 = arith.addf %59, %60 : vector<1x128xf32>
      %62 = math.rsqrt %61 : vector<1x128xf32>
      %63 = arith.mulf %12, %62 : vector<1x128xf32>
      %64 = arith.mulf %50, %63 : vector<1x128xf32>
      %65 = arith.subf %13, %64 : vector<1x128xf32>
      %66 = vector.broadcast %63 : vector<1x128xf32> to vector<16x128xf32>
      %67 = arith.mulf %46, %66 : vector<16x128xf32>
      %68 = vector.broadcast %65 : vector<1x128xf32> to vector<16x128xf32>
      %69 = arith.addf %67, %68 : vector<16x128xf32>
      %cst_32 = arith.constant 0.000000e+00 : f32
      %70 = vector.broadcast %cst_32 : f32 to vector<16x128xf32>
      %71 = arith.maximumf %69, %70 : vector<16x128xf32>
      %cst_33 = arith.constant dense<0.000000e+00> : vector<16x128xf32>
      %72 = tpu.matmul %71, %18, %cst_33 {dimension_numbers = #tpu.dot_dimension_numbers<[1], [0], [0], [1], [0, 0, 1, 1], [], []>} : vector<16x128xf32>, vector<128x128xf32>, vector<16x128xf32> -> vector<16x128xf32>
      %cst_34 = arith.constant dense<0.000000e+00> : vector<128xf32>
      %73 = vector.multi_reduction <add>, %72, %cst_34 [0] : vector<16x128xf32> to vector<128xf32>
      %74 = vector.shape_cast %73 : vector<128xf32> to vector<1x128xf32>
      %cst_35 = arith.constant 6.250000e-02 : f32
      %75 = vector.broadcast %cst_35 : f32 to vector<1x128xf32>
      %76 = arith.mulf %74, %75 : vector<1x128xf32>
      %77 = arith.mulf %72, %72 : vector<16x128xf32>
      %cst_36 = arith.constant dense<0.000000e+00> : vector<128xf32>
      %78 = vector.multi_reduction <add>, %77, %cst_36 [0] : vector<16x128xf32> to vector<128xf32>
      %79 = vector.shape_cast %78 : vector<128xf32> to vector<1x128xf32>
      %cst_37 = arith.constant 6.250000e-02 : f32
      %80 = vector.broadcast %cst_37 : f32 to vector<1x128xf32>
      %81 = arith.mulf %79, %80 : vector<1x128xf32>
      %82 = arith.mulf %76, %76 : vector<1x128xf32>
      %83 = arith.subf %81, %82 : vector<1x128xf32>
      %cst_38 = arith.constant 0.000000e+00 : f32
      %84 = vector.broadcast %cst_38 : f32 to vector<1x128xf32>
      %85 = arith.maximumf %83, %84 : vector<1x128xf32>
      %cst_39 = arith.constant 9.99999974E-6 : f32
      %86 = vector.broadcast %cst_39 : f32 to vector<1x128xf32>
      %87 = arith.addf %85, %86 : vector<1x128xf32>
      %88 = math.rsqrt %87 : vector<1x128xf32>
      %89 = arith.mulf %14, %88 : vector<1x128xf32>
      %90 = arith.mulf %76, %89 : vector<1x128xf32>
      %91 = arith.subf %15, %90 : vector<1x128xf32>
      %92 = vector.broadcast %89 : vector<1x128xf32> to vector<16x128xf32>
      %93 = arith.mulf %72, %92 : vector<16x128xf32>
      %94 = vector.broadcast %91 : vector<1x128xf32> to vector<16x128xf32>
      %95 = arith.addf %93, %94 : vector<16x128xf32>
      %cst_40 = arith.constant 0.000000e+00 : f32
      %96 = vector.broadcast %cst_40 : f32 to vector<16x128xf32>
      %97 = arith.maximumf %95, %96 : vector<16x128xf32>
      %cst_41 = arith.constant dense<0.000000e+00> : vector<16x128xf32>
      %98 = tpu.matmul %97, %19, %cst_41 {dimension_numbers = #tpu.dot_dimension_numbers<[1], [0], [0], [1], [0, 0, 1, 1], [], []>} : vector<16x128xf32>, vector<128x128xf32>, vector<16x128xf32> -> vector<16x128xf32>
      %99 = vector.broadcast %16 : vector<1x128xf32> to vector<16x128xf32>
      %100 = arith.addf %98, %99 : vector<16x128xf32>
      %c0_42 = arith.constant 0 : index
      %c0_43 = arith.constant 0 : index
      %101 = vector.load %arg4[%c0_42, %c0_43] : memref<16x128xf32, #tpu.memory_space<vmem>>, vector<16x128xf32>
      tpu.vector_store %arg4[%c0_42, %c0_43], %100 {strides = array<i32>} : memref<16x128xf32, #tpu.memory_space<vmem>>, vector<16x128xf32>,
    } else {
    }
    return
  }
  func.func @transform_0(%arg0: i32) -> (i32, i32) {
    %c0_i32 = arith.constant 0 : i32
    %c0_i32_0 = arith.constant 0 : i32
    return %arg0, %c0_i32 : i32, i32
  }
  func.func @transform_1(%arg0: i32) -> (i32, i32) {
    %c0_i32 = arith.constant 0 : i32
    %c0_i32_0 = arith.constant 0 : i32
    %c0_i32_1 = arith.constant 0 : i32
    return %c0_i32, %c0_i32_0 : i32, i32
  }
  func.func @transform_2(%arg0: i32) -> (i32, i32) {
    %c0_i32 = arith.constant 0 : i32
    %c0_i32_0 = arith.constant 0 : i32
    %c0_i32_1 = arith.constant 0 : i32
    return %c0_i32, %c0_i32_0 : i32, i32
  }
  func.func @transform_3(%arg0: i32) -> (i32, i32) {
    %c0_i32 = arith.constant 0 : i32
    %c0_i32_0 = arith.constant 0 : i32
    %c0_i32_1 = arith.constant 0 : i32
    return %c0_i32, %c0_i32_0 : i32, i32
  }
}

</mosaic_0001>

<bundles_post_ra>
// kernel: tpu_custom_call.1
= control target key start
LH: loop header
LB: loop body
LE: loop exit
PB: predicated region body
PF: predicated region fallthrough
CT: control target
= control target key end

     0   :  { %8 = vsyncpa [#allocation4], 0  ;;  %s1126_s0 = inlined_call_operand.hbm [shape: f32[16,128], index: 0, kind: input, shape index: {}]   ;;  %s1127_s1 = inlined_call_operand.hbm [shape: f32[512,128], index: 1, kind: input, shape index: {}]   ;;  %s1128_s2 = inlined_call_operand.hbm [shape: f32[8,128], index: 2, kind: input, shape index: {}]   ;;  %s1129_s3 = inlined_call_operand.hbm [shape: f32[16,128], index: 3, kind: output, shape index: {}]  }
   0x1   :  { %9 = vsyncpa [#allocation7], 0 }
   0x2   :  { %10 = vsyncpa [#allocation5], 0  ;;  %s1028_s12 = smov [#allocation6]   ;;  %s1029_s14 = smov [#allocation3]  }
   0x3   :  { %s28_s13 = sshll.u32 %s1028_s12, 4  ;;  %s16_s15 = sshll.u32 %s1029_s14, 4  ;;  %s29_s13 = int_to_ptr.vmem [resolvable:$true] %s28_s13  ;;  %s1054_s15 = int_to_ptr.vmem [resolvable:$true] %s16_s15 }
   0x4   :  { %s934_s18 = scalar_lea.hbm %s1127_s1, 8192 }
   0x5   :  { %p935_p0 = scmp.ne.s32.totalorder %s1127_s1, %s934_s18  ;;  %p938_p1 = scmp.lt.u32.totalorder %s934_s18, %s1127_s1 }
   0x7   :  { %p940_p2 = pnand %p938_p1, %p935_p0 }
   0x9   :  { %943 = shalt.err (!%p940_p2)
}
   0xa   :  { %s944_s23 = scalar_lea.vmem %s29_s13, 8192  ;;  %p949_p4 = scmp.lt.s32.totalorder %s29_s13, %s29_s13 }
   0xb   :  { %p945_p3 = scmp.ne.s32.totalorder %s29_s13, %s944_s23  ;;  %p950_p5 = scmp.lt.s32.totalorder %s944_s23, %s944_s23 }
   0xd   :  { %p951_p6 = por %p950_p5, %p949_p4 }
   0xf   :  { %p952_p7 = pnand %p951_p6, %p945_p3 }
  0x11   :  { %955 = shalt.err (!%p952_p7)
}
  0x12   :  { %s1030_s24 = smov 128   ;;  %s1031_s25 = smov 8  }
  0x13   :  { %34 = dma.hbm_to_vmem [thread:$0]  %s1127_s1, 8192, %s29_s13, [#allocation7], %s1030_s24, %s1030_s24, %s1031_s25  }
  0x14   :  { %s956_s30 = scalar_lea.hbm %s1126_s0, 256 }
  0x15   :  { %p957_p8 = scmp.ne.s32.totalorder %s1126_s0, %s956_s30  ;;  %p960_p9 = scmp.lt.u32.totalorder %s956_s30, %s1126_s0 }
  0x17   :  { %p962_p10 = pnand %p960_p9, %p957_p8 }
  0x19   :  { %965 = shalt.err (!%p962_p10)
}
  0x1a   :  { %s966_s8 = scalar_lea.vmem %s1054_s15, 256  ;;  %p971_p12 = scmp.lt.s32.totalorder %s1054_s15, %s1054_s15 }
  0x1b   :  { %p967_p11 = scmp.ne.s32.totalorder %s1054_s15, %s966_s8  ;;  %p972_p13 = scmp.lt.s32.totalorder %s966_s8, %s966_s8 }
  0x1d   :  { %p973_p0 = por %p972_p13, %p971_p12 }
  0x1f   :  { %p974_p1 = pnand %p973_p0, %p967_p11 }
  0x21   :  { %977 = shalt.err (!%p974_p1)
}
  0x22   :  { %22 = dma.hbm_to_vmem [thread:$0]  %s1126_s0, 256, %s1054_s15, [#allocation4], %s1030_s24, %s1030_s24, %s1031_s25  }
  0x23   :  { %s1032_s10 = smov [#allocation8]   ;;  %s978_s14 = scalar_lea.hbm %s1128_s2, 128 }
  0x24   :  { %s41_s11 = sshll.u32 %s1032_s10, 4  ;;  %p979_p2 = scmp.ne.s32.totalorder %s1128_s2, %s978_s14  ;;  %s42_s11 = int_to_ptr.vmem [resolvable:$true] %s41_s11 }
  0x25   :  { %p982_p3 = scmp.lt.u32.totalorder %s978_s14, %s1128_s2 }
  0x27   :  { %p984_p4 = pnand %p982_p3, %p979_p2 }
  0x29   :  { %987 = shalt.err (!%p984_p4)
}
  0x2a   :  { %s988_s20 = scalar_lea.vmem %s42_s11, 128  ;;  %p993_p6 = scmp.lt.s32.totalorder %s42_s11, %s42_s11 }
  0x2b   :  { %p989_p5 = scmp.ne.s32.totalorder %s42_s11, %s988_s20  ;;  %p994_p7 = scmp.lt.s32.totalorder %s988_s20, %s988_s20 }
  0x2d   :  { %p995_p8 = por %p994_p7, %p993_p6 }
  0x2f   :  { %p996_p9 = pnand %p995_p8, %p989_p5 }
  0x31   :  { %999 = shalt.err (!%p996_p9)
}
  0x32   :  { %44 = dma.hbm_to_vmem [thread:$0]  %s1128_s2, 128, %s42_s11, [#allocation7]  }
  0x33   :  { %1022 = dma.done.wait [#allocation4], 256  }
  0x34   :  { %1023 = vsyncadd [#allocation4], 4294967040 }
  0x35   :  { %1024 = dma.done.wait [#allocation7], 8320  }
  0x36   :  { %1025 = vsyncadd [#allocation7], 4294958976  ;;  %v54_v0 = vld [vmem:[#allocation6] sm:$0xff]  ;;  %v55_v1 = vld [vmem:[#allocation6 + $0x8] sm:$0xff]  ;;  %s1033_s2 = smov [#allocation9]  }
  0x37   :  { %v56_v2 = vld [vmem:[#allocation6 + $0x10] sm:$0xff]  ;;  %v794_v3 = vpack.c.bf16 %v55_v1, %v54_v0  ;;  %v57_v4 = vld [vmem:[#allocation6 + $0x18] sm:$0xff]  ;;  %v58_v6 = vld [vmem:[#allocation6 + $0x20] sm:$0xff]  ;;  %s568_s21 = sshll.u32 %s1033_s2, 4  ;;  %s569_s21 = int_to_ptr.vmem [resolvable:$true] %s568_s21 }
  0x38   :  { %v798_v5 = vpack.c.bf16 %v57_v4, %v56_v2  ;;  %v59_v7 = vld [vmem:[#allocation6 + $0x28] sm:$0xff]  ;;  %v71_v9 = vld [vmem:[#allocation3] sm:$0xff]  ;;  %v61_v11 = vld [vmem:[#allocation6 + $0x38] sm:$0xff]  ;;  %s1000_s22 = scalar_lea.vmem %s569_s21, 256  ;;  %p1005_p11 = scmp.lt.s32.totalorder %s569_s21, %s569_s21 }
  0x39   :  { %795 = vmatprep.subr.bf16.mxu0 %v794_v3  ;;  %v802_v8 = vpack.c.bf16 %v59_v7, %v58_v6  ;;  %v60_v10 = vld [vmem:[#allocation6 + $0x30] sm:$0xff]  ;;  %686 = vmatprep.mubr.f32.mxu0 %v71_v9  ;;  %v62_v13 = vld [vmem:[#allocation6 + $0x40] sm:$0xff]  ;;  %v63_v14 = vld [vmem:[#allocation6 + $0x48] sm:$0xff]  ;;  %p1001_p10 = scmp.ne.s32.totalorder %s569_s21, %s1000_s22  ;;  %p1006_p12 = scmp.lt.s32.totalorder %s1000_s22, %s1000_s22 }
  0x3a   :  { %797 = vmatpush3.bf16.msra.mxu0 %v794_v3  ;;  %v806_v12 = vpack.c.bf16 %v61_v11, %v60_v10  ;;  %v810_v15 = vpack.c.bf16 %v63_v14, %v62_v13  ;;  %v64_v16 = vld [vmem:[#allocation6 + $0x50] sm:$0xff]  ;;  %v65_v17 = vld [vmem:[#allocation6 + $0x58] sm:$0xff]  ;;  %v66_v19 = vld [vmem:[#allocation6 + $0x60] sm:$0xff]  ;;  %v238_v10 = vlaneseq }
  0x3b   :  { %799 = vmatprep.subr.bf16.mxu0 %v798_v5  ;;  %v814_v18 = vpack.c.bf16 %v65_v17, %v64_v16  ;;  %v67_v20 = vld [vmem:[#allocation6 + $0x68] sm:$0xff]  ;;  %v68_v22 = vld [vmem:[#allocation6 + $0x70] sm:$0xff]  ;;  %v69_v23 = vld [vmem:[#allocation6 + $0x78] sm:$0xff]  ;;  %p1007_p13 = por %p1006_p12, %p1005_p11 }
  0x3c   :  { %v818_v21 = vpack.c.bf16 %v67_v20, %v66_v19  ;;  %v822_v24 = vpack.c.bf16 %v69_v23, %v68_v22  ;;  %v72_v25 = vld [vmem:[#allocation3 + $0x8] sm:$0xff]  ;;  %v162_v26 = vld [vmem:[#allocation6 + $0x80] sm:$0xff]  ;;  %v163_v27 = vld [vmem:[#allocation6 + $0x88] sm:$0xff]  ;;  %v239_v11 = vshrl.u32 %v238_v10, 7 }
  0x3d   :  { %v826_v28 = vpack.c.bf16 %v163_v27, %v162_v26  ;;  %v164_v29 = vld [vmem:[#allocation6 + $0x90] sm:$0xff]  ;;  %v165_v30 = vld [vmem:[#allocation6 + $0x98] sm:$0xff]  ;;  %v166_v31 = vld [vmem:[#allocation6 + $0xa0] sm:$0xff]  ;;  %p1008_p0 = pnand %p1007_p13, %p1001_p10 }
  0x3e   :  { %801 = vmatpush3.bf16.msra.mxu0 %v798_v5  ;;  %v830_v32 = vpack.c.bf16 %v165_v30, %v164_v29  ;;  %v167_v33 = vld [vmem:[#allocation6 + $0xa8] sm:$0xff]  ;;  %v168_v35 = vld [vmem:[#allocation6 + $0xb0] sm:$0xff]  ;;  %v169_v36 = vld [vmem:[#allocation6 + $0xb8] sm:$0xff]  ;;  %v1103_v13 = vsub.s32 0, %v239_v11 }
  0x3f   :  { %803 = vmatprep.subr.bf16.mxu0 %v802_v8  ;;  %827 = vmatprep.subr.bf16.mxu1 %v826_v28  ;;  %v834_v34 = vpack.c.bf16 %v167_v33, %v166_v31  ;;  %v838_v37 = vpack.c.bf16 %v169_v36, %v168_v35  ;;  %v170_v38 = vld [vmem:[#allocation6 + $0xc0] sm:$0xff]  ;;  %v171_v39 = vld [vmem:[#allocation6 + $0xc8] sm:$0xff]  ;;  %v172_v41 = vld [vmem:[#allocation6 + $0xd0] sm:$0xff] }
  0x40   :  { %829 = vmatpush3.bf16.msra.mxu1 %v826_v28  ;;  %v842_v40 = vpack.c.bf16 %v171_v39, %v170_v38  ;;  %v173_v42 = vld [vmem:[#allocation6 + $0xd8] sm:$0xff]  ;;  %v174_v44 = vld [vmem:[#allocation6 + $0xe0] sm:$0xff]  ;;  %v175_v45 = vld [vmem:[#allocation6 + $0xe8] sm:$0xff] }
  0x41   :  { %831 = vmatprep.subr.bf16.mxu1 %v830_v32  ;;  %v846_v43 = vpack.c.bf16 %v173_v42, %v172_v41  ;;  %v850_v46 = vpack.c.bf16 %v175_v45, %v174_v44  ;;  %v176_v47 = vld [vmem:[#allocation6 + $0xf0] sm:$0xff]  ;;  %v177_v48 = vld [vmem:[#allocation6 + $0xf8] sm:$0xff]  ;;  %v156_v16 = vld [vmem:[#allocation8 + $0x1] sm:$0x1] }
  0x42   :  { %805 = vmatpush3.bf16.msra.mxu0 %v802_v8  ;;  %v854_v49 = vpack.c.bf16 %v177_v48, %v176_v47  ;;  %v178_v27 = vld [vmem:[#allocation6 + $0x100] sm:$0xff]  ;;  %v179_v28 = vld [vmem:[#allocation6 + $0x108] sm:$0xff]  ;;  %v180_v30 = vld [vmem:[#allocation6 + $0x110] sm:$0xff] }
  0x43   :  { %807 = vmatprep.subr.bf16.mxu0 %v806_v12  ;;  %v858_v29 = vpack.c.bf16 %v179_v28, %v178_v27  ;;  %v181_v31 = vld [vmem:[#allocation6 + $0x118] sm:$0xff]  ;;  %v182_v33 = vld [vmem:[#allocation6 + $0x120] sm:$0xff]  ;;  %v184_v36 = vld [vmem:[#allocation6 + $0x130] sm:$0xff] }
  0x44   :  { %833 = vmatpush3.bf16.msra.mxu1 %v830_v32  ;;  %v862_v32 = vpack.c.bf16 %v181_v31, %v180_v30  ;;  %v186_v39 = vld [vmem:[#allocation6 + $0x140] sm:$0xff]  ;;  %v188_v42 = vld [vmem:[#allocation6 + $0x150] sm:$0xff]  ;;  %v195_v27 = vld [vmem:[#allocation6 + $0x188] sm:$0xff] }
  0x45   :  { %835 = vmatprep.subr.bf16.mxu1 %v834_v34  ;;  %v190_v45 = vld [vmem:[#allocation6 + $0x160] sm:$0xff]  ;;  %v192_v48 = vld [vmem:[#allocation6 + $0x170] sm:$0xff]  ;;  %v197_v30 = vld [vmem:[#allocation6 + $0x198] sm:$0xff] }
  0x46   :  { %809 = vmatpush3.bf16.msra.mxu0 %v806_v12  ;;  %v155_v12 = vld [vmem:[#allocation8] sm:$0x1]  ;;  %v157_v11 = vld [vmem:[#allocation8 + $0x2] sm:$0x1] }
  0x47   :  { %811 = vmatprep.subr.bf16.mxu0 %v810_v15 }
  0x48   :  { %837 = vmatpush3.bf16.msra.mxu1 %v834_v34  ;;  %v183_v34 = vld [vmem:[#allocation6 + $0x128] sm:$0xff] }
  0x49   :  { %839 = vmatprep.subr.bf16.mxu1 %v838_v37  ;;  %v866_v35 = vpack.c.bf16 %v183_v34, %v182_v33  ;;  %v199_v33 = vld [vmem:[#allocation6 + $0x1a8] sm:$0xff] }
  0x4a   :  { %813 = vmatpush3.bf16.msra.mxu0 %v810_v15 }
  0x4b   :  { %815 = vmatprep.subr.bf16.mxu0 %v814_v18 }
  0x4c   :  { %841 = vmatpush3.bf16.msra.mxu1 %v838_v37  ;;  %v185_v37 = vld [vmem:[#allocation6 + $0x138] sm:$0xff] }
  0x4d   :  { %843 = vmatprep.subr.bf16.mxu1 %v842_v40  ;;  %v870_v38 = vpack.c.bf16 %v185_v37, %v184_v36  ;;  %v201_v36 = vld [vmem:[#allocation6 + $0x1b8] sm:$0xff] }
  0x4e   :  { %817 = vmatpush3.bf16.msra.mxu0 %v814_v18 }
  0x4f   :  { %819 = vmatprep.subr.bf16.mxu0 %v818_v21 }
  0x50   :  { %845 = vmatpush3.bf16.msra.mxu1 %v842_v40  ;;  %v187_v40 = vld [vmem:[#allocation6 + $0x148] sm:$0xff] }
  0x51   :  { %847 = vmatprep.subr.bf16.mxu1 %v846_v43  ;;  %v874_v41 = vpack.c.bf16 %v187_v40, %v186_v39  ;;  %v203_v39 = vld [vmem:[#allocation6 + $0x1c8] sm:$0xff] }
  0x52   :  { %821 = vmatpush3.bf16.msra.mxu0 %v818_v21 }
  0x53   :  { %823 = vmatprep.subr.bf16.mxu0 %v822_v24 }
  0x54   :  { %849 = vmatpush3.bf16.msra.mxu1 %v846_v43  ;;  %v189_v43 = vld [vmem:[#allocation6 + $0x158] sm:$0xff] }
  0x55   :  { %851 = vmatprep.subr.bf16.mxu1 %v850_v46  ;;  %v878_v44 = vpack.c.bf16 %v189_v43, %v188_v42  ;;  %v205_v42 = vld [vmem:[#allocation6 + $0x1d8] sm:$0xff] }
  0x56   :  { %825 = vmatpush3.bf16.msra.mxu0 %v822_v24 }
  0x57   :  { %859 = vmatprep.subr.bf16.mxu0 %v858_v29 }
  0x58   :  { %853 = vmatpush3.bf16.msra.mxu1 %v850_v46  ;;  %v191_v46 = vld [vmem:[#allocation6 + $0x168] sm:$0xff] }
  0x59   :  { %687 = vmatmul.mubr.f32.vlgmr.msra.gmra.mrb[0].mxu0 %v72_v25  ;;  %855 = vmatprep.subr.bf16.mxu1 %v854_v49  ;;  %v882_v47 = vpack.c.bf16 %v191_v46, %v190_v45  ;;  %v207_v45 = vld [vmem:[#allocation6 + $0x1e8] sm:$0xff] }
  0x5a   :  { %861 = vmatpush3.bf16.msra.mxu0 %v858_v29  ;;  %v196_v29 = vld [vmem:[#allocation6 + $0x190] sm:$0xff] }
  0x5b   :  { %863 = vmatprep.subr.bf16.mxu0 %v862_v32  ;;  %v894_v31 = vpack.c.bf16 %v197_v30, %v196_v29 }
  0x5c   :  { %857 = vmatpush3.bf16.msra.mxu1 %v854_v49  ;;  %v193_v49 = vld [vmem:[#allocation6 + $0x178] sm:$0xff] }
  0x5e   :  { %865 = vmatpush3.bf16.msra.mxu0 %v862_v32  ;;  %v198_v32 = vld [vmem:[#allocation6 + $0x1a0] sm:$0xff] }
  0x5f   :  { %867 = vmatprep.subr.bf16.mxu0 %v866_v35  ;;  %v898_v34 = vpack.c.bf16 %v199_v33, %v198_v32 }
  0x62   :  { %869 = vmatpush3.bf16.msra.mxu0 %v866_v35  ;;  %v200_v35 = vld [vmem:[#allocation6 + $0x1b0] sm:$0xff] }
  0x63   :  { %871 = vmatprep.subr.bf16.mxu0 %v870_v38  ;;  %v902_v37 = vpack.c.bf16 %v201_v36, %v200_v35 }
  0x66   :  { %873 = vmatpush3.bf16.msra.mxu0 %v870_v38  ;;  %v202_v38 = vld [vmem:[#allocation6 + $0x1c0] sm:$0xff] }
  0x67   :  { %875 = vmatprep.subr.bf16.mxu0 %v874_v41  ;;  %v906_v40 = vpack.c.bf16 %v203_v39, %v202_v38 }
  0x6a   :  { %877 = vmatpush3.bf16.msra.mxu0 %v874_v41  ;;  %v204_v41 = vld [vmem:[#allocation6 + $0x1d0] sm:$0xff] }
  0x6b   :  { %879 = vmatprep.subr.bf16.mxu0 %v878_v44  ;;  %v910_v43 = vpack.c.bf16 %v205_v42, %v204_v41 }
  0x6e   :  { %881 = vmatpush3.bf16.msra.mxu0 %v878_v44  ;;  %v206_v44 = vld [vmem:[#allocation6 + $0x1e0] sm:$0xff] }
  0x6f   :  { %883 = vmatprep.subr.bf16.mxu0 %v882_v47  ;;  %v914_v46 = vpack.c.bf16 %v207_v45, %v206_v44 }
  0x72   :  { %885 = vmatpush3.bf16.msra.mxu0 %v882_v47  ;;  %v208_v47 = vld [vmem:[#allocation6 + $0x1f0] sm:$0xff] }
 0x12c   :  { %v688_v50 = vpop.f32.mrb[0].mxu0 }
 0x12d   :  { %v221_v51 = vmul.f32 %v688_v50, %v688_v50  ;;  %v139_v52 = vpop.f32.mrb[1].mxu0 }
 0x12e   :  { %v212_v53 = vadd.f32 %v688_v50, %v139_v52  ;;  %v220_v54 = vmul.f32 %v139_v52, %v139_v52 }
 0x130   :  { %v213_v55 = vrot.slane %v212_v53, 4  ;;  %v222_v56 = vadd.f32 %v221_v51, %v220_v54 }
 0x132   :  { %v214_v57 = vadd.f32 %v213_v55, %v212_v53  ;;  %v223_v58 = vrot.slane %v222_v56, 4 }
 0x134   :  { %v215_v59 = vrot.slane %v214_v57, 2  ;;  %v224_v60 = vadd.f32 %v223_v58, %v222_v56 }
 0x136   :  { %v216_v61 = vadd.f32 %v215_v59, %v214_v57  ;;  %v225_v62 = vrot.slane %v224_v60, 2 }
 0x138   :  { %v217_v63 = vrot.slane %v216_v61, 1  ;;  %v226_v0 = vadd.f32 %v225_v62, %v224_v60 }
 0x13a   :  { %v227_v1 = vrot.slane %v226_v0, 1  ;;  %v218_v2 = vadd.f32 %v217_v63, %v216_v61 }
 0x13c   :  { %v228_v3 = vadd.f32 %v227_v1, %v226_v0  ;;  %v219_v4 = vmul.f32 0.0625, %v218_v2 }
 0x13e   :  { %v229_v5 = vmul.f32 0.0625, %v228_v3  ;;  %v230_v6 = vmul.f32 %v219_v4, %v219_v4 }
 0x140   :  { %v231_v7 = vsub.f32 %v229_v5, %v230_v6 }
 0x142   :  { %v232_v8 = vmax.f32 %v231_v7, 0.0 }
 0x144   :  { %v233_v9 = vadd.f32 1e-05, %v232_v8 }
 0x146   :  { %928 = vrsqrt.f32 %v233_v9 }
 0x150   :  { %v929_v14 = vpop.eup %928 }
 0x151   :  { %v235_v15 = vmul.f32 %v929_v14, %v155_v12 }
 0x153   :  { %v236_v17 = vmul.f32 %v235_v15, %v219_v4  ;;  %v241_v18 = vrot.slane %v235_v15, %v1103_v13  ;;  %v158_v15 = vld [vmem:[#allocation8 + $0x3] sm:$0x1] }
 0x155   :  { %v237_v19 = vsub.f32 %v156_v16, %v236_v17  ;;  %v242_v20 = vmul.f32 %v241_v18, %v139_v52  ;;  %v243_v21 = vmul.f32 %v688_v50, %v241_v18  ;;  %v886_v50 = vpack.c.bf16 %v193_v49, %v192_v48  ;;  %v209_v48 = vld [vmem:[#allocation6 + $0x1f8] sm:$0xff] }
 0x156   :  { %v918_v49 = vpack.c.bf16 %v209_v48, %v208_v47 }
 0x157   :  { %v247_v22 = vrot.slane %v237_v19, %v1103_v13  ;;  %887 = vmatprep.subr.bf16.mxu0 %v886_v50 }
 0x158   :  { %889 = vmatpush3.bf16.msra.mxu0 %v886_v50 }
 0x159   :  { %v248_v23 = vadd.f32 %v247_v22, %v242_v20  ;;  %v249_v24 = vadd.f32 %v247_v22, %v243_v21 }
 0x15b   :  { %v250_v25 = vmax.f32 %v248_v23, 0.0  ;;  %v251_v26 = vmax.f32 %v249_v24, 0.0 }
 0x15d   :  { %721 = vmatprep.mubr.f32.mxu1 %v250_v25 }
 0x15e   :  { %722 = vmatmul.mubr.f32.vlgmr.msra.gmra.mrb[0].mxu1 %v251_v26  ;;  %v194_v26 = vld [vmem:[#allocation6 + $0x180] sm:$0xff] }
 0x15f   :  { %v890_v28 = vpack.c.bf16 %v195_v27, %v194_v26 }
 0x161   :  { %891 = vmatprep.subr.bf16.mxu1 %v890_v28 }
 0x162   :  { %893 = vmatpush3.bf16.msra.mxu1 %v890_v28 }
 0x163   :  { %895 = vmatprep.subr.bf16.mxu1 %v894_v31 }
 0x166   :  { %897 = vmatpush3.bf16.msra.mxu1 %v894_v31 }
 0x167   :  { %899 = vmatprep.subr.bf16.mxu1 %v898_v34 }
 0x16a   :  { %901 = vmatpush3.bf16.msra.mxu1 %v898_v34 }
 0x16b   :  { %903 = vmatprep.subr.bf16.mxu1 %v902_v37 }
 0x16e   :  { %905 = vmatpush3.bf16.msra.mxu1 %v902_v37 }
 0x16f   :  { %907 = vmatprep.subr.bf16.mxu1 %v906_v40 }
 0x172   :  { %909 = vmatpush3.bf16.msra.mxu1 %v906_v40 }
 0x173   :  { %911 = vmatprep.subr.bf16.mxu1 %v910_v43 }
 0x176   :  { %913 = vmatpush3.bf16.msra.mxu1 %v910_v43 }
 0x177   :  { %915 = vmatprep.subr.bf16.mxu1 %v914_v46 }
 0x17a   :  { %917 = vmatpush3.bf16.msra.mxu1 %v914_v46 }
 0x17b   :  { %919 = vmatprep.subr.bf16.mxu1 %v918_v49 }
 0x17e   :  { %921 = vmatpush3.bf16.msra.mxu1 %v918_v49 }
 0x231   :  { %v723_v51 = vpop.f32.mrb[0].mxu1 }
 0x232   :  { %v336_v52 = vmul.f32 %v723_v51, %v723_v51  ;;  %v318_v53 = vpop.f32.mrb[1].mxu1 }
 0x233   :  { %v327_v54 = vadd.f32 %v723_v51, %v318_v53  ;;  %v335_v55 = vmul.f32 %v318_v53, %v318_v53 }
 0x235   :  { %v328_v56 = vrot.slane %v327_v54, 4  ;;  %v337_v57 = vadd.f32 %v336_v52, %v335_v55 }
 0x237   :  { %v329_v58 = vadd.f32 %v328_v56, %v327_v54  ;;  %v338_v59 = vrot.slane %v337_v57, 4 }
 0x239   :  { %v330_v60 = vrot.slane %v329_v58, 2  ;;  %v339_v61 = vadd.f32 %v338_v59, %v337_v57 }
 0x23b   :  { %v331_v62 = vadd.f32 %v330_v60, %v329_v58  ;;  %v340_v63 = vrot.slane %v339_v61, 2 }
 0x23d   :  { %v332_v0 = vrot.slane %v331_v62, 1  ;;  %v341_v1 = vadd.f32 %v340_v63, %v339_v61 }
 0x23f   :  { %v333_v2 = vadd.f32 %v332_v0, %v331_v62  ;;  %v342_v3 = vrot.slane %v341_v1, 1 }
 0x241   :  { %v334_v4 = vmul.f32 0.0625, %v333_v2  ;;  %v343_v5 = vadd.f32 %v342_v3, %v341_v1 }
 0x243   :  { %v344_v6 = vmul.f32 0.0625, %v343_v5  ;;  %v345_v7 = vmul.f32 %v334_v4, %v334_v4 }
 0x245   :  { %v346_v8 = vsub.f32 %v344_v6, %v345_v7 }
 0x247   :  { %v347_v9 = vmax.f32 %v346_v8, 0.0 }
 0x249   :  { %v348_v10 = vadd.f32 1e-05, %v347_v9 }
 0x24b   :  { %930 = vrsqrt.f32 %v348_v10  ;;  %v159_v10 = vld [vmem:[#allocation8 + $0x4] sm:$0x1] }
 0x255   :  { %v931_v12 = vpop.eup %930 }
 0x256   :  { %v350_v14 = vmul.f32 %v931_v12, %v157_v11 }
 0x258   :  { %v351_v16 = vmul.f32 %v350_v14, %v334_v4  ;;  %v356_v17 = vrot.slane %v350_v14, %v1103_v13  ;;  %v160_v14 = vld [vmem:[#allocation8 + $0x5] sm:$0x1] }
 0x25a   :  { %v357_v18 = vmul.f32 %v356_v17, %v318_v53  ;;  %v358_v19 = vmul.f32 %v723_v51, %v356_v17  ;;  %v352_v20 = vsub.f32 %v158_v15, %v351_v16 }
 0x25c   :  { %v362_v21 = vrot.slane %v352_v20, %v1103_v13 }
 0x25e   :  { %v363_v22 = vadd.f32 %v362_v21, %v357_v18  ;;  %v364_v23 = vadd.f32 %v362_v21, %v358_v19 }
 0x260   :  { %v365_v24 = vmax.f32 %v363_v22, 0.0  ;;  %v366_v25 = vmax.f32 %v364_v23, 0.0 }
 0x262   :  { %756 = vmatprep.mubr.f32.mxu0 %v365_v24 }
 0x263   :  { %757 = vmatmul.mubr.f32.vlgmr.msra.gmra.mrb[2].mxu0 %v366_v25  ;;  %v581_v25 = vld [vmem:[#allocation8 + $0x6] ss:$0 sm:$0xff] }
 0x336   :  { %v758_v50 = vpop.f32.mrb[2].mxu0 }
 0x337   :  { %v451_v51 = vmul.f32 %v758_v50, %v758_v50  ;;  %v433_v52 = vpop.f32.mrb[3].mxu0 }
 0x338   :  { %v442_v53 = vadd.f32 %v758_v50, %v433_v52  ;;  %v450_v54 = vmul.f32 %v433_v52, %v433_v52 }
 0x33a   :  { %v443_v55 = vrot.slane %v442_v53, 4  ;;  %v452_v56 = vadd.f32 %v451_v51, %v450_v54 }
 0x33c   :  { %v444_v57 = vadd.f32 %v443_v55, %v442_v53  ;;  %v453_v58 = vrot.slane %v452_v56, 4 }
 0x33e   :  { %v445_v59 = vrot.slane %v444_v57, 2  ;;  %v454_v60 = vadd.f32 %v453_v58, %v452_v56 }
 0x340   :  { %v446_v61 = vadd.f32 %v445_v59, %v444_v57  ;;  %v455_v62 = vrot.slane %v454_v60, 2 }
 0x342   :  { %v447_v63 = vrot.slane %v446_v61, 1  ;;  %v456_v0 = vadd.f32 %v455_v62, %v454_v60 }
 0x344   :  { %v448_v1 = vadd.f32 %v447_v63, %v446_v61  ;;  %v457_v2 = vrot.slane %v456_v0, 1 }
 0x346   :  { %v449_v3 = vmul.f32 0.0625, %v448_v1  ;;  %v458_v4 = vadd.f32 %v457_v2, %v456_v0 }
 0x348   :  { %v459_v5 = vmul.f32 0.0625, %v458_v4  ;;  %v460_v6 = vmul.f32 %v449_v3, %v449_v3 }
 0x34a   :  { %v461_v7 = vsub.f32 %v459_v5, %v460_v6 }
 0x34c   :  { %v462_v8 = vmax.f32 %v461_v7, 0.0 }
 0x34e   :  { %v463_v9 = vadd.f32 1e-05, %v462_v8 }
 0x350   :  { %932 = vrsqrt.f32 %v463_v9 }
 0x35a   :  { %v933_v11 = vpop.eup %932 }
 0x35b   :  { %v465_v12 = vmul.f32 %v933_v11, %v159_v10 }
 0x35d   :  { %v466_v15 = vmul.f32 %v465_v12, %v449_v3  ;;  %v471_v16 = vrot.slane %v465_v12, %v1103_v13 }
 0x35f   :  { %v467_v17 = vsub.f32 %v160_v14, %v466_v15  ;;  %v472_v18 = vmul.f32 %v471_v16, %v433_v52  ;;  %v473_v19 = vmul.f32 %v758_v50, %v471_v16 }
 0x361   :  { %v477_v20 = vrot.slane %v467_v17, %v1103_v13 }
 0x363   :  { %v478_v21 = vadd.f32 %v477_v20, %v472_v18  ;;  %v479_v22 = vadd.f32 %v477_v20, %v473_v19 }
 0x365   :  { %v480_v23 = vmax.f32 %v478_v21, 0.0  ;;  %v481_v24 = vmax.f32 %v479_v22, 0.0 }
 0x367   :  { %791 = vmatprep.mubr.f32.mxu1 %v480_v23 }
 0x368   :  { %792 = vmatmul.mubr.f32.vlgmr.msra.gmra.mrb[2].mxu1 %v481_v24 }
 0x43b   :  { %v793_v26 = vpop.f32.mrb[2].mxu1 }
 0x43c   :  { %v558_v27 = vadd.f32 %v793_v26, %v581_v25  ;;  %v552_v28 = vpop.f32.mrb[3].mxu1 }
 0x43d   :  { %v553_v29 = vadd.f32 %v581_v25, %v552_v28 }
 0x43e   :  { %562 = vst [vmem:[#allocation9 + $0x8] sm:$0xff] %v558_v27 }
 0x43f   :  { %561 = vst [vmem:[#allocation9] sm:$0xff] %v553_v29 }
 0x440   :  { %1011 = shalt.err (!%p1008_p0)
}
 0x441   :  { %s1012_s27 = scalar_lea.hbm %s1129_s3, 256 }
 0x442   :  { %p1013_p1 = scmp.ne.s32.totalorder %s1129_s3, %s1012_s27  ;;  %p1016_p2 = scmp.lt.u32.totalorder %s1012_s27, %s1129_s3 }
 0x444   :  { %p1018_p3 = pnand %p1016_p2, %p1013_p1 }
 0x446   :  { %1021 = shalt.err (!%p1018_p3)
}
 0x447   :  { %574 = dma.vmem_to_hbm [thread:$0]  %s569_s21, 256, %s1129_s3, [#allocation5], %s1030_s24, %s1030_s24, %s1031_s25  }
 0x448   :  { %1026 = dma.done.wait [#allocation5], 256  }
 0x449   :  { %1027 = vsyncadd [#allocation5], 4294967040 }
 0x44a   :  { %578 = vsyncpa [#allocation4], 1 }
 0x44b   :  { %579 = vsyncpa [#allocation7], 1 }
 0x44c   :  { %580 = vsyncpa [#allocation5], 1 }

</bundles_post_ra>
